<compile_context>
chip_gen: v7x
topology: tpu7x:2x2x1
jax: 0.10.0
libtpu: 0.0.40
codegen_flags: <defaults>
</compile_context>

<pallas_src>
import functools

import jax
import jax.numpy as jnp
import numpy as np
from jax.experimental import pallas as pl
from jax.experimental.pallas import tpu as pltpu


def _round_up(x, m):
    return (x + m - 1) // m * m


def _posed_head_kernel(params_ref, pose_ref, mean_ref, basis_ref, o_ref, *, n_pad):
    # params_ref: (TB, K)        deformation params (f32 or bf16)
    # pose_ref:   (TB, 8)        [tx, ty, s, qx, qy, qz, qw, 0]
    # mean_ref:   (1, 3*Np)      packed mean planes  [x | y | z], f32 (resident across steps)
    # basis_ref:  (K, 3*Np)      packed basis planes [x | y | z]     (resident across steps)
    # o_ref:      (TB, 3*Np)     packed output planes [x | y | z]
    f32 = jnp.float32

    # Deformable head: mean + params @ basis as ONE fused MXU dot over all three coordinate
    # planes (384-lane RHS -> single push/drain, f32 accumulation).
    local = mean_ref[...].astype(f32) + jnp.dot(
        params_ref[...], basis_ref[...], preferred_element_type=f32)
    lx = local[:, 0 * n_pad:1 * n_pad]      # 128-aligned lane slices: vreg-aligned, free
    ly = local[:, 1 * n_pad:2 * n_pad]
    lz = local[:, 2 * n_pad:3 * n_pad]

    # Pose: translation, uniform scale, quaternion (x, y, z, w; real-last, Hamilton convention).
    pose = pose_ref[...].astype(f32)
    tx = pose[:, 0:1]
    ty = pose[:, 1:2]
    s = pose[:, 2:3]
    qx = pose[:, 3:4]
    qy = pose[:, 4:5]
    qz = pose[:, 5:6]
    qw = pose[:, 6:7]

    xx = qx * qx
    yy = qy * qy
    zz = qz * qz
    xy = qx * qy
    xz = qx * qz
    yz = qy * qz
    wx = qw * qx
    wy = qw * qy
    wz = qw * qz

    r00 = 1.0 - 2.0 * (yy + zz)
    r01 = 2.0 * (xy - wz)
    r02 = 2.0 * (xz + wy)
    r10 = 2.0 * (xy + wz)
    r11 = 1.0 - 2.0 * (xx + zz)
    r12 = 2.0 * (yz - wx)
    r20 = 2.0 * (xz - wy)
    r21 = 2.0 * (yz + wx)
    r22 = 1.0 - 2.0 * (xx + yy)

    # rigid_transformation_25d: rotate, uniform scale (incl. z), translate x/y only.
    o_ref[:, 0 * n_pad:1 * n_pad] = (s * (r00 * lx + r01 * ly + r02 * lz) + tx).astype(o_ref.dtype)
    o_ref[:, 1 * n_pad:2 * n_pad] = (s * (r10 * lx + r11 * ly + r12 * lz) + ty).astype(o_ref.dtype)
    o_ref[:, 2 * n_pad:3 * n_pad] = (s * (r20 * lx + r21 * ly + r22 * lz)).astype(o_ref.dtype)


def prepare_deformable_head_constants(keypts_mean, deform_basis, compute_dtype=None):
    """Repack the blendshape constants into the lane-packed plane layout the kernel expects.

    Call ONCE at model init (hoisted out of the per-forward path):
      keypts_mean:  (N, 3)   -> packed_mean  (1, 3*N_pad)  f32
      deform_basis: (K, N, 3)-> packed_basis (K, 3*N_pad)  compute_dtype (default: input dtype)
    """
    N = keypts_mean.shape[0]
    K = deform_basis.shape[0]
    n_pad = _round_up(N, 128)
    mean = jnp.transpose(keypts_mean.astype(jnp.float32), (1, 0))   # (3, N)
    basis = jnp.transpose(deform_basis, (0, 2, 1))                   # (K, 3, N)
    if n_pad != N:
        mean = jnp.pad(mean, ((0, 0), (0, n_pad - N)))
        basis = jnp.pad(basis, ((0, 0), (0, 0), (0, n_pad - N)))
    packed_mean = mean.reshape(1, 3 * n_pad)
    packed_basis = basis.reshape(K, 3 * n_pad)
    if compute_dtype is not None:
        packed_basis = packed_basis.astype(compute_dtype)            # e.g. bf16: halves DMA + VMEM
    return packed_mean, packed_basis, n_pad


def posed_deformable_head_packed(coord, quats, params, packed_mean, packed_basis, n_pad,
                                 out_dtype=jnp.float32):
    """Runs the kernel; returns the lane-packed (B, 3*N_pad) slab [x-plane | y-plane | z-plane].

    Downstream consumers should prefer this layout directly (avoids a full re-read/re-write of
    the result just to interleave the 3 channels).
    """
    B = coord.shape[0]
    K = params.shape[-1]
    params = params.astype(packed_basis.dtype)

    # Merge coord (B,3) + quats (B,4) into one (B,8) pose tensor -> single tiny DMA per step.
    pose = jnp.concatenate(
        [coord.astype(jnp.float32), quats.astype(jnp.float32),
         jnp.zeros((B, 1), jnp.float32)], axis=-1)

    # Batch tiling: large tiles (per-step work is tiny, so the ~0.35us per-grid-step overhead
    # dominates at small tiles), while keeping >=2 grid steps when possible so the "parallel"
    # batch axis can be sharded across v7x's two TensorCores.  Even TB=512 keeps the
    # double-buffered output block far under every generation's scoped VMEM limit.
    B_pad8 = _round_up(B, 8)
    TB = min(B_pad8, 512)
    if B_pad8 > 8 and B_pad8 // TB < 2:
        TB = _round_up((B_pad8 + 1) // 2, 8)
    B_pad = _round_up(B_pad8, TB)
    if B_pad != B:
        # NOTE: zero-padded rows give q = 0 -> R = I and scale = 0; harmless since those rows
        # are sliced off below (do NOT "fix" this with a normalization -- it would divide by 0).
        params = jnp.pad(params, ((0, B_pad - B), (0, 0)))
        pose = jnp.pad(pose, ((0, B_pad - B), (0, 0)))

    grid = (B_pad // TB,)
    kernel = functools.partial(_posed_head_kernel, n_pad=n_pad)

    out = pl.pallas_call(
        kernel,
        out_shape=jax.ShapeDtypeStruct((B_pad, 3 * n_pad), out_dtype),
        grid_spec=pltpu.PrefetchScalarGridSpec(
            num_scalar_prefetch=0,
            grid=grid,
            in_specs=[
                pl.BlockSpec((TB, K), lambda b: (b, 0)),           # params
                pl.BlockSpec((TB, 8), lambda b: (b, 0)),           # pose (coord + quats merged)
                pl.BlockSpec((1, 3 * n_pad), lambda b: (0, 0)),    # packed mean  (resident)
                pl.BlockSpec((K, 3 * n_pad), lambda b: (0, 0)),    # packed basis (resident)
            ],
            out_specs=pl.BlockSpec((TB, 3 * n_pad), lambda b: (b, 0)),
        ),
        compiler_params=pltpu.CompilerParams(dimension_semantics=("parallel",)),
    )(params, pose, packed_mean, packed_basis)
    return out[:B]


def posed_deformable_head(coord, quats, params, keypts_mean, deform_basis,
                          compute_dtype=None, out_dtype=jnp.float32):
    """Full PosedDeformableHead.forward semantics: returns (B, N, 3) posed keypoints.

    Args:
      coord:        (B, 3)      -- (tx, ty, scale)
      quats:        (B, 4)      -- normalized quaternions (x, y, z, w)
      params:       (B, K)      -- deformation parameters
      keypts_mean:  (N, 3)      -- mean keypoints of the deformable head
      deform_basis: (K, N, 3)   -- linear blendshape basis
      compute_dtype: optional dtype (e.g. jnp.bfloat16) for the params/basis dot inputs
                     (accumulation stays f32).
      out_dtype:     kernel output dtype (f32 default; bf16 halves writeback bytes).
    """
    packed_mean, packed_basis, n_pad = prepare_deformable_head_constants(
        keypts_mean, deform_basis, compute_dtype)
    slab = posed_deformable_head_packed(
        coord, quats, params, packed_mean, packed_basis, n_pad, out_dtype=out_dtype)
    B = coord.shape[0]
    N = keypts_mean.shape[0]
    # TODO(synk): consumers should accept posed_deformable_head_packed()'s (B, 3*N_pad) plane
    # layout directly; this final slice+transpose re-reads/re-writes the whole result in XLA and
    # roughly doubles HBM traffic for a writeback-bound kernel.
    return jnp.transpose(slab.reshape(B, 3, n_pad)[:, :, :N], (0, 2, 1)).astype(jnp.float32)


def posed_deformable_head_ref(coord, quats, params, keypts_mean, deform_basis):
    """Pure-JAX reference mirroring the PyTorch forward exactly."""
    f32 = jnp.float32
    local = keypts_mean.astype(f32)[None] + jnp.einsum(
        "bk,knc->bnc", params.astype(f32), deform_basis.astype(f32)
    )  # (B, N, 3)

    q = quats.astype(f32)
    x, y, z, w = q[:, 0], q[:, 1], q[:, 2], q[:, 3]
    R = jnp.stack(
        [
            jnp.stack([1 - 2 * (y * y + z * z), 2 * (x * y - w * z), 2 * (x * z + w * y)], -1),
            jnp.stack([2 * (x * y + w * z), 1 - 2 * (x * x + z * z), 2 * (y * z - w * x)], -1),
            jnp.stack([2 * (x * z - w * y), 2 * (y * z + w * x), 1 - 2 * (x * x + y * y)], -1),
        ],
        axis=-2,
    )  # (B, 3, 3)

    rot = jnp.einsum("bij,bnj->bni", R, local)
    out = rot * coord.astype(f32)[:, 2][:, None, None]              # uniform scale (incl. z)
    out = out.at[..., :2].add(coord.astype(f32)[:, None, :2])       # translate x/y only
    return out


if __name__ == "__main__":
    key = jax.random.PRNGKey(0)
    kc, kq, kp, km, kb = jax.random.split(key, 5)

    B, K, N = 2, 10, 68
    coord = jax.random.normal(kc, (B, 3), dtype=jnp.float32)
    coord = coord.at[:, 2].set(jnp.abs(coord[:, 2]) + 0.5)          # positive scale
    q = jax.random.normal(kq, (B, 4), dtype=jnp.float32)
    quats = q / jnp.linalg.norm(q, axis=-1, keepdims=True)          # module assumes normalized
    params = 0.1 * jax.random.normal(kp, (B, K), dtype=jnp.float32)
    keypts_mean = jax.random.normal(km, (N, 3), dtype=jnp.float32)
    deform_basis = 0.05 * jax.random.normal(kb, (K, N, 3), dtype=jnp.float32)

    ref = posed_deformable_head_ref(coord, quats, params, keypts_mean, deform_basis)

    # Default (f32 compute / f32 output): tight check against the reference.
    out = jax.block_until_ready(
        posed_deformable_head(coord, quats, params, keypts_mean, deform_basis)
    )
    assert out.shape == (B, N, 3) and out.dtype == jnp.float32
    assert out.shape[-1] == 3 and out.shape[:-2] == quats.shape[:-1]
    np.testing.assert_allclose(np.asarray(out), np.asarray(ref), rtol=1e-4, atol=1e-4)

    # Optional bf16 compute path (halves params DMA + resident basis VMEM): looser check.
    out_bf16 = jax.block_until_ready(
        posed_deformable_head(coord, quats, params, keypts_mean, deform_basis,
                              compute_dtype=jnp.bfloat16)
    )
    np.testing.assert_allclose(np.asarray(out_bf16), np.asarray(ref), rtol=2e-2, atol=2e-2)

    print("KERNEL_OK")
</pallas_src>

<mosaic_0001>
module attributes {stable_mosaic.version = 11 : i64} {
  func.func @_posed_head_kernel(%arg0: i32, %arg1: memref<8x10xf32, #tpu.memory_space<vmem>>, %arg2: memref<8x8xf32, #tpu.memory_space<vmem>>, %arg3: memref<1x384xf32, #tpu.memory_space<vmem>>, %arg4: memref<10x384xf32, #tpu.memory_space<vmem>>, %arg5: memref<8x384xf32, #tpu.memory_space<vmem>>) attributes {dimension_semantics = [#tpu.dimension_semantics<parallel>], iteration_bounds = array<i64: 1>, scalar_prefetch = 0 : i64, scratch_operands = 0 : i64, tpu.core_type = #tpu.core_type<tc>, window_params = [{transform_indices = @transform_0, window_bounds = array<i64: 8, 10>}, {transform_indices = @transform_1, window_bounds = array<i64: 8, 8>}, {pipeline_mode = #tpu.pipeline_mode<synchronous>, transform_indices = @transform_2, window_bounds = array<i64: 1, 384>}, {pipeline_mode = #tpu.pipeline_mode<synchronous>, transform_indices = @transform_3, window_bounds = array<i64: 10, 384>}, {transform_indices = @transform_4, window_bounds = array<i64: 8, 384>}]} {
    %c0 = arith.constant 0 : index
    %c0_0 = arith.constant 0 : index
    %0 = vector.load %arg3[%c0, %c0_0] : memref<1x384xf32, #tpu.memory_space<vmem>>, vector<1x384xf32>
    %c0_1 = arith.constant 0 : index
    %c0_2 = arith.constant 0 : index
    %1 = vector.load %arg1[%c0_1, %c0_2] : memref<8x10xf32, #tpu.memory_space<vmem>>, vector<8x10xf32>
    %c0_3 = arith.constant 0 : index
    %c0_4 = arith.constant 0 : index
    %2 = vector.load %arg4[%c0_3, %c0_4] : memref<10x384xf32, #tpu.memory_space<vmem>>, vector<10x384xf32>
    %cst = arith.constant dense<0.000000e+00> : vector<8x384xf32>
    %3 = tpu.matmul %1, %2, %cst {dimension_numbers = #tpu.dot_dimension_numbers<[1], [0], [0], [1], [0, 0, 1, 1], [], []>} : vector<8x10xf32>, vector<10x384xf32>, vector<8x384xf32> -> vector<8x384xf32>
    %4 = vector.broadcast %0 : vector<1x384xf32> to vector<8x384xf32>
    %5 = arith.addf %4, %3 : vector<8x384xf32>
    %6 = vector.extract_strided_slice %5 {offsets = [0, 0], sizes = [8, 128], strides = [1, 1]} : vector<8x384xf32> to vector<8x128xf32>
    %7 = vector.extract_strided_slice %5 {offsets = [0, 128], sizes = [8, 128], strides = [1, 1]} : vector<8x384xf32> to vector<8x128xf32>
    %8 = vector.extract_strided_slice %5 {offsets = [0, 256], sizes = [8, 128], strides = [1, 1]} : vector<8x384xf32> to vector<8x128xf32>
    %c0_5 = arith.constant 0 : index
    %c0_6 = arith.constant 0 : index
    %9 = vector.load %arg2[%c0_5, %c0_6] : memref<8x8xf32, #tpu.memory_space<vmem>>, vector<8x8xf32>
    %10 = vector.extract_strided_slice %9 {offsets = [0, 0], sizes = [8, 1], strides = [1, 1]} : vector<8x8xf32> to vector<8x1xf32>
    %11 = vector.extract_strided_slice %9 {offsets = [0, 1], sizes = [8, 1], strides = [1, 1]} : vector<8x8xf32> to vector<8x1xf32>
    %12 = vector.extract_strided_slice %9 {offsets = [0, 2], sizes = [8, 1], strides = [1, 1]} : vector<8x8xf32> to vector<8x1xf32>
    %13 = vector.extract_strided_slice %9 {offsets = [0, 3], sizes = [8, 1], strides = [1, 1]} : vector<8x8xf32> to vector<8x1xf32>
    %14 = vector.extract_strided_slice %9 {offsets = [0, 4], sizes = [8, 1], strides = [1, 1]} : vector<8x8xf32> to vector<8x1xf32>
    %15 = vector.extract_strided_slice %9 {offsets = [0, 5], sizes = [8, 1], strides = [1, 1]} : vector<8x8xf32> to vector<8x1xf32>
    %16 = vector.extract_strided_slice %9 {offsets = [0, 6], sizes = [8, 1], strides = [1, 1]} : vector<8x8xf32> to vector<8x1xf32>
    %17 = arith.mulf %13, %13 : vector<8x1xf32>
    %18 = arith.mulf %14, %14 : vector<8x1xf32>
    %19 = arith.mulf %15, %15 : vector<8x1xf32>
    %20 = arith.mulf %13, %14 : vector<8x1xf32>
    %21 = arith.mulf %13, %15 : vector<8x1xf32>
    %22 = arith.mulf %14, %15 : vector<8x1xf32>
    %23 = arith.mulf %16, %13 : vector<8x1xf32>
    %24 = arith.mulf %16, %14 : vector<8x1xf32>
    %25 = arith.mulf %16, %15 : vector<8x1xf32>
    %26 = arith.addf %18, %19 : vector<8x1xf32>
    %cst_7 = arith.constant 2.000000e+00 : f32
    %27 = vector.broadcast %cst_7 : f32 to vector<8x1xf32>
    %28 = arith.mulf %27, %26 : vector<8x1xf32>
    %cst_8 = arith.constant 1.000000e+00 : f32
    %29 = vector.broadcast %cst_8 : f32 to vector<8x1xf32>
    %30 = arith.subf %29, %28 : vector<8x1xf32>
    %31 = arith.subf %20, %25 : vector<8x1xf32>
    %cst_9 = arith.constant 2.000000e+00 : f32
    %32 = vector.broadcast %cst_9 : f32 to vector<8x1xf32>
    %33 = arith.mulf %32, %31 : vector<8x1xf32>
    %34 = arith.addf %21, %24 : vector<8x1xf32>
    %cst_10 = arith.constant 2.000000e+00 : f32
    %35 = vector.broadcast %cst_10 : f32 to vector<8x1xf32>
    %36 = arith.mulf %35, %34 : vector<8x1xf32>
    %37 = arith.addf %20, %25 : vector<8x1xf32>
    %cst_11 = arith.constant 2.000000e+00 : f32
    %38 = vector.broadcast %cst_11 : f32 to vector<8x1xf32>
    %39 = arith.mulf %38, %37 : vector<8x1xf32>
    %40 = arith.addf %17, %19 : vector<8x1xf32>
    %cst_12 = arith.constant 2.000000e+00 : f32
    %41 = vector.broadcast %cst_12 : f32 to vector<8x1xf32>
    %42 = arith.mulf %41, %40 : vector<8x1xf32>
    %cst_13 = arith.constant 1.000000e+00 : f32
    %43 = vector.broadcast %cst_13 : f32 to vector<8x1xf32>
    %44 = arith.subf %43, %42 : vector<8x1xf32>
    %45 = arith.subf %22, %23 : vector<8x1xf32>
    %cst_14 = arith.constant 2.000000e+00 : f32
    %46 = vector.broadcast %cst_14 : f32 to vector<8x1xf32>
    %47 = arith.mulf %46, %45 : vector<8x1xf32>
    %48 = arith.subf %21, %24 : vector<8x1xf32>
    %cst_15 = arith.constant 2.000000e+00 : f32
    %49 = vector.broadcast %cst_15 : f32 to vector<8x1xf32>
    %50 = arith.mulf %49, %48 : vector<8x1xf32>
    %51 = arith.addf %22, %23 : vector<8x1xf32>
    %cst_16 = arith.constant 2.000000e+00 : f32
    %52 = vector.broadcast %cst_16 : f32 to vector<8x1xf32>
    %53 = arith.mulf %52, %51 : vector<8x1xf32>
    %54 = arith.addf %17, %18 : vector<8x1xf32>
    %cst_17 = arith.constant 2.000000e+00 : f32
    %55 = vector.broadcast %cst_17 : f32 to vector<8x1xf32>
    %56 = arith.mulf %55, %54 : vector<8x1xf32>
    %cst_18 = arith.constant 1.000000e+00 : f32
    %57 = vector.broadcast %cst_18 : f32 to vector<8x1xf32>
    %58 = arith.subf %57, %56 : vector<8x1xf32>
    %59 = vector.broadcast %30 : vector<8x1xf32> to vector<8x128xf32>
    %60 = arith.mulf %59, %6 : vector<8x128xf32>
    %61 = vector.broadcast %33 : vector<8x1xf32> to vector<8x128xf32>
    %62 = arith.mulf %61, %7 : vector<8x128xf32>
    %63 = arith.addf %60, %62 : vector<8x128xf32>
    %64 = vector.broadcast %36 : vector<8x1xf32> to vector<8x128xf32>
    %65 = arith.mulf %64, %8 : vector<8x128xf32>
    %66 = arith.addf %63, %65 : vector<8x128xf32>
    %67 = vector.broadcast %12 : vector<8x1xf32> to vector<8x128xf32>
    %68 = arith.mulf %67, %66 : vector<8x128xf32>
    %69 = vector.broadcast %10 : vector<8x1xf32> to vector<8x128xf32>
    %70 = arith.addf %68, %69 : vector<8x128xf32>
    %c0_19 = arith.constant 0 : index
    %c0_20 = arith.constant 0 : index
    %71 = vector.load %arg5[%c0_19, %c0_20] : memref<8x384xf32, #tpu.memory_space<vmem>>, vector<8x128xf32>
    tpu.vector_store %arg5[%c0_19, %c0_20], %70 {strides = array<i32>} : memref<8x384xf32, #tpu.memory_space<vmem>>, vector<8x128xf32>,
    %72 = vector.broadcast %39 : vector<8x1xf32> to vector<8x128xf32>
    %73 = arith.mulf %72, %6 : vector<8x128xf32>
    %74 = vector.broadcast %44 : vector<8x1xf32> to vector<8x128xf32>
    %75 = arith.mulf %74, %7 : vector<8x128xf32>
    %76 = arith.addf %73, %75 : vector<8x128xf32>
    %77 = vector.broadcast %47 : vector<8x1xf32> to vector<8x128xf32>
    %78 = arith.mulf %77, %8 : vector<8x128xf32>
    %79 = arith.addf %76, %78 : vector<8x128xf32>
    %80 = vector.broadcast %12 : vector<8x1xf32> to vector<8x128xf32>
    %81 = arith.mulf %80, %79 : vector<8x128xf32>
    %82 = vector.broadcast %11 : vector<8x1xf32> to vector<8x128xf32>
    %83 = arith.addf %81, %82 : vector<8x128xf32>
    %c0_21 = arith.constant 0 : index
    %c128 = arith.constant 128 : index
    %84 = vector.load %arg5[%c0_21, %c128] : memref<8x384xf32, #tpu.memory_space<vmem>>, vector<8x128xf32>
    tpu.vector_store %arg5[%c0_21, %c128], %83 {strides = array<i32>} : memref<8x384xf32, #tpu.memory_space<vmem>>, vector<8x128xf32>,
    %85 = vector.broadcast %50 : vector<8x1xf32> to vector<8x128xf32>
    %86 = arith.mulf %85, %6 : vector<8x128xf32>
    %87 = vector.broadcast %53 : vector<8x1xf32> to vector<8x128xf32>
    %88 = arith.mulf %87, %7 : vector<8x128xf32>
    %89 = arith.addf %86, %88 : vector<8x128xf32>
    %90 = vector.broadcast %58 : vector<8x1xf32> to vector<8x128xf32>
    %91 = arith.mulf %90, %8 : vector<8x128xf32>
    %92 = arith.addf %89, %91 : vector<8x128xf32>
    %93 = vector.broadcast %12 : vector<8x1xf32> to vector<8x128xf32>
    %94 = arith.mulf %93, %92 : vector<8x128xf32>
    %c0_22 = arith.constant 0 : index
    %c256 = arith.constant 256 : index
    %95 = vector.load %arg5[%c0_22, %c256] : memref<8x384xf32, #tpu.memory_space<vmem>>, vector<8x128xf32>
    tpu.vector_store %arg5[%c0_22, %c256], %94 {strides = array<i32>} : memref<8x384xf32, #tpu.memory_space<vmem>>, vector<8x128xf32>,
    return
  }
  func.func @transform_0(%arg0: i32) -> (i32, i32) {
    %c0_i32 = arith.constant 0 : i32
    %c0_i32_0 = arith.constant 0 : i32
    return %arg0, %c0_i32 : i32, i32
  }
  func.func @transform_1(%arg0: i32) -> (i32, i32) {
    %c0_i32 = arith.constant 0 : i32
    %c0_i32_0 = arith.constant 0 : i32
    return %arg0, %c0_i32 : i32, i32
  }
  func.func @transform_2(%arg0: i32) -> (i32, i32) {
    %c0_i32 = arith.constant 0 : i32
    %c0_i32_0 = arith.constant 0 : i32
    %c0_i32_1 = arith.constant 0 : i32
    return %c0_i32, %c0_i32_0 : i32, i32
  }
  func.func @transform_3(%arg0: i32) -> (i32, i32) {
    %c0_i32 = arith.constant 0 : i32
    %c0_i32_0 = arith.constant 0 : i32
    %c0_i32_1 = arith.constant 0 : i32
    return %c0_i32, %c0_i32_0 : i32, i32
  }
  func.func @transform_4(%arg0: i32) -> (i32, i32) {
    %c0_i32 = arith.constant 0 : i32
    %c0_i32_0 = arith.constant 0 : i32
    return %arg0, %c0_i32 : i32, i32
  }
}

</mosaic_0001>

<bundles_post_ra>
// kernel: tpu_custom_call.1
= control target key start
LH: loop header
LB: loop body
LE: loop exit
PB: predicated region body
PF: predicated region fallthrough
CT: control target
= control target key end

     0   :  { %9 = vsyncpa [#allocation3], 0  ;;  %s666_s0 = inlined_call_operand.hbm [shape: f32[8,10], index: 0, kind: input, shape index: {}]   ;;  %s667_s1 = inlined_call_operand.hbm [shape: f32[8,8], index: 1, kind: input, shape index: {}]   ;;  %s668_s2 = inlined_call_operand.vmem [shape: f32[1,384], index: 2, kind: input, shape index: {}]   ;;  %s669_s3 = inlined_call_operand.hbm [shape: f32[10,384], index: 3, kind: input, shape index: {}]   ;;  %s670_s4 = inlined_call_operand.hbm [shape: f32[8,384], index: 4, kind: output, shape index: {}]  }
   0x1   :  { %10 = vsyncpa [#allocation6], 0 }
   0x2   :  { %11 = vsyncpa [#allocation4], 0  ;;  %s540_s15 = smov [#allocation5]   ;;  %s541_s17 = smov [#allocation2]  }
   0x3   :  { %s28_s16 = sshll.u32 %s540_s15, 4  ;;  %s18_s18 = sshll.u32 %s541_s17, 4  ;;  %s29_s16 = int_to_ptr.vmem [resolvable:$true] %s28_s16  ;;  %s19_s18 = int_to_ptr.vmem [resolvable:$true] %s18_s18 }
   0x4   :  { %s446_s21 = scalar_lea.hbm %s667_s1, 128 }
   0x5   :  { %p447_p0 = scmp.ne.s32.totalorder %s667_s1, %s446_s21  ;;  %p450_p1 = scmp.lt.u32.totalorder %s446_s21, %s667_s1 }
   0x7   :  { %p452_p2 = pnand %p450_p1, %p447_p0 }
   0x9   :  { %455 = shalt.err (!%p452_p2)
}
   0xa   :  { %s456_s26 = scalar_lea.vmem %s29_s16, 128  ;;  %p461_p4 = scmp.lt.s32.totalorder %s29_s16, %s29_s16 }
   0xb   :  { %p457_p3 = scmp.ne.s32.totalorder %s29_s16, %s456_s26  ;;  %p462_p5 = scmp.lt.s32.totalorder %s456_s26, %s456_s26 }
   0xd   :  { %p463_p6 = por %p462_p5, %p461_p4 }
   0xf   :  { %p464_p7 = pnand %p463_p6, %p457_p3 }
  0x11   :  { %467 = shalt.err (!%p464_p7)
}
  0x12   :  { %31 = dma.hbm_to_vmem [thread:$0]  %s667_s1, 128, %s29_s16, [#allocation6]  }
  0x13   :  { %s468_s5 = scalar_lea.hbm %s666_s0, 128 }
  0x14   :  { %p469_p8 = scmp.ne.s32.totalorder %s666_s0, %s468_s5  ;;  %p472_p9 = scmp.lt.u32.totalorder %s468_s5, %s666_s0 }
  0x16   :  { %p474_p10 = pnand %p472_p9, %p469_p8 }
  0x18   :  { %477 = shalt.err (!%p474_p10)
}
  0x19   :  { %s478_s10 = scalar_lea.vmem %s19_s18, 128  ;;  %p483_p12 = scmp.lt.s32.totalorder %s19_s18, %s19_s18 }
  0x1a   :  { %p479_p11 = scmp.ne.s32.totalorder %s19_s18, %s478_s10  ;;  %p484_p13 = scmp.lt.s32.totalorder %s478_s10, %s478_s10 }
  0x1c   :  { %p485_p0 = por %p484_p13, %p483_p12 }
  0x1e   :  { %p486_p1 = pnand %p485_p0, %p479_p11 }
  0x20   :  { %489 = shalt.err (!%p486_p1)
}
  0x21   :  { %21 = dma.hbm_to_vmem [thread:$0]  %s666_s0, 128, %s19_s18, [#allocation3]  }
  0x22   :  { %s542_s12 = smov [#allocation7]   ;;  %s490_s16 = scalar_lea.hbm %s669_s3, 768 }
  0x23   :  { %s39_s13 = sshll.u32 %s542_s12, 4  ;;  %p491_p2 = scmp.ne.s32.totalorder %s669_s3, %s490_s16  ;;  %s40_s13 = int_to_ptr.vmem [resolvable:$true] %s39_s13 }
  0x24   :  { %p494_p3 = scmp.lt.u32.totalorder %s490_s16, %s669_s3 }
  0x26   :  { %p496_p4 = pnand %p494_p3, %p491_p2 }
  0x28   :  { %499 = shalt.err (!%p496_p4)
}
  0x29   :  { %s500_s22 = scalar_lea.vmem %s40_s13, 768  ;;  %p505_p6 = scmp.lt.s32.totalorder %s40_s13, %s40_s13 }
  0x2a   :  { %p501_p5 = scmp.ne.s32.totalorder %s40_s13, %s500_s22  ;;  %p506_p7 = scmp.lt.s32.totalorder %s500_s22, %s500_s22 }
  0x2c   :  { %p507_p8 = por %p506_p7, %p505_p6 }
  0x2e   :  { %p508_p9 = pnand %p507_p8, %p501_p5 }
  0x30   :  { %511 = shalt.err (!%p508_p9)
}
  0x31   :  { %s543_s0 = smov 384   ;;  %s544_s18 = smov 24  }
  0x32   :  { %45 = dma.hbm_to_vmem [thread:$0]  %s669_s3, 768, %s40_s13, [#allocation6], %s543_s0, %s543_s0, %s544_s18  }
  0x33   :  { %534 = dma.done.wait [#allocation3], 128  }
  0x34   :  { %535 = vsyncadd [#allocation3], 4294967168 }
  0x35   :  { %536 = dma.done.wait [#allocation6], 896  }
  0x36   :  { %537 = vsyncadd [#allocation6], 4294966400  ;;  %v545_v0 = vmov 0.0   ;;  %vm67_vm0 = vcmask 1041408   ;;  %v546_v1 = vmov 0.0|0.0   ;;  %vm547_vm1 = vmmov 0  }
  0x37   :  { %141 = vmatprep.mubr.f32.mxu0 %v545_v0  ;;  %413 = vmatprep.subr.bf16.mxu1 %v546_v1  ;;  %vm548_vm2 = vmmov 1   ;;  %v626_v3 = vld [vmem:[#allocation5] sm:$0xff]  ;;  %v58_v4 = vld [vmem:[#allocation7 + $0x8] sm:$0xff]  ;;  %v61_v5 = vld [vmem:[#allocation7 + $0x20] sm:$0x3]  ;;  %s549_s3 = smov 1   ;;  %v219_v57 = vlaneseq }
  0x38   :  { %404 = vmatprep.mubr.msk.f32.mxu1 %vm547_vm1, %v545_v0  ;;  %vm622_vm3 = vmpackc.low %vm67_vm0, %vm548_vm2  ;;  %256 = vrot.lane.b32.xlu0 %v626_v3, %s549_s3  ;;  %s550_s25 = smov 2   ;;  %v407_v6 = vpack.c.bf16 %v61_v5, %v58_v4  ;;  %v57_v7 = vld [vmem:[#allocation7] sm:$0xff]  ;;  %v60_v8 = vld [vmem:[#allocation7 + $0x18] sm:$0x3]  ;;  %v551_v12 = vmov 4   ;;  %vm63_vm4 = vcmask 80896   ;;  %v238_v15 = vmul.f32 %v626_v3, %v626_v3 }
  0x39   :  { %252 = vrot.lane.b32.xlu1 %v626_v3, %s550_s25  ;;  %v410_v9 = vpack.c.bf16 %v60_v8, %v57_v7  ;;  %v59_v10 = vld [vmem:[#allocation7 + $0x10] sm:$0xff]  ;;  %v62_v11 = vld [vmem:[#allocation7 + $0x28] sm:$0x3]  ;;  %438 = vset.pattern.permute.xlu0 %v551_v12  ;;  %s552_s26 = smov 3   ;;  %s553_s27 = smov 127   ;;  %v555_v16 = vmov 3  }
  0x3a   :  { %409 = vmatprep.subr.msk.bf16.mxu0 %vm622_vm3, %v407_v6  ;;  %v414_v13 = vpack.c.bf16 %v62_v11, %v59_v10  ;;  %v56_v14 = vld [vmem:[#allocation2] sm:$0xff]  ;;  %s554_s28 = smov 126   ;;  %440 = vset.pattern.permute.xlu1 %v555_v16  ;;  %s556_s29 = smov 125   ;;  %v557_v49 = vmov 0   ;;  %v558_v55 = vmov 2   ;;  %v559_v56 = vmov 1  }
  0x3b   :  { %412 = vmatpush1.bf16.msk.msra.mxu0 %vm622_vm3, %v410_v9  ;;  %v220_v58 = vshrl.u32 %v219_v57, 7  ;;  %v55_v60 = vld [vmem:[%s668_s2] sm:$0x7]  ;;  %s560_s2 = smov [#allocation8]  }
  0x3c   :  { %248 = vrot.lane.b32.xlu0 %v626_v3, %s552_s26  ;;  %416 = vmatpush3.bf16.msk.msra.mxu1 %vm622_vm3, %v414_v13  ;;  %s382_s6 = sshll.u32 %s560_s2, 4  ;;  %s383_s6 = int_to_ptr.vmem [resolvable:$true] %s382_s6 }
  0x3d   :  { %240 = vrot.lane.b32.xlu1 %v626_v3, %s553_s27  ;;  %v221_v59 = vsub.s32 0, %v220_v58  ;;  %v225_v62 = vsub.s32 1, %v220_v58  ;;  %v229_v5 = vsub.s32 2, %v220_v58  ;;  %s512_s7 = scalar_lea.vmem %s383_s6, 384  ;;  %p517_p11 = scmp.lt.s32.totalorder %s383_s6, %s383_s6 }
  0x3e   :  { %394 = vmatmul.mubr.msk.f32.vlgmr.msra.gmra.mrb[0].mxu0 %vm63_vm4, %v56_v14  ;;  %p513_p10 = scmp.ne.s32.totalorder %s383_s6, %s512_s7  ;;  %p518_p12 = scmp.lt.s32.totalorder %s512_s7, %s512_s7 }
  0x3f   :  { %405 = vmatmul.mubr.msk.f32.vlgmr.msra.gmra.mrb[0].mxu1 %vm63_vm4, %v56_v14  ;;  %v222_v61 = vrot.slane %v55_v60, %v221_v59  ;;  %v226_v0 = vrot.slane %v55_v60, %v225_v62 }
  0x40   :  { %261 = vrot.lane.b32.xlu0 %v238_v15, %s553_s27  ;;  %p519_p13 = por %p518_p12, %p517_p11 }
  0x41   :  { %281 = vrot.lane.b32.xlu1 %v238_v15, %s554_s28 }
  0x42   :  { %p520_p0 = pnand %p519_p13, %p513_p10 }
  0x44   :  { %244 = vrot.lane.b32.xlu0 %v626_v3, %s554_s28 }
  0xaa   :  { %v257_v17 = vpop.permute.xlu0 %256 }
  0xab   :  { %v253_v18 = vpop.permute.xlu1 %252  ;;  %v259_v19 = vmul.f32 %v257_v17, %v626_v3 }
  0xac   :  { %v255_v20 = vmul.f32 %v253_v18, %v626_v3 }
  0xad   :  { %268 = vrot.lane.b32.xlu1 %v259_v19, %s556_s29 }
  0xae   :  { %274 = vrot.lane.b32.xlu0 %v255_v20, %s556_s29  ;;  %v249_v21 = vpop.permute.xlu0 %248 }
  0xaf   :  { %v241_v22 = vpop.permute.xlu1 %240  ;;  %v251_v23 = vmul.f32 %v249_v21, %v626_v3 }
  0xb0   :  { %v243_v36 = vmul.f32 %v241_v22, %v626_v3 }
  0xb1   :  { %288 = vrot.lane.b32.xlu1 %v251_v23, %s554_s28 }
  0xb2   :  { %v262_v24 = vpop.permute.xlu0 %261 }
  0xb3   :  { %v282_v25 = vpop.permute.xlu1 %281  ;;  %v264_v26 = vadd.f32 %v262_v24, %v238_v15 }
  0xb4   :  { %v284_v27 = vadd.f32 %v282_v25, %v238_v15 }
  0xb5   :  { %v265_v28 = vmul.f32 2.0, %v264_v26 }
  0xb6   :  { %v285_v29 = vmul.f32 2.0, %v284_v27  ;;  %v245_v34 = vpop.permute.xlu0 %244 }
  0xb7   :  { %v266_v30 = vsub.f32 1.0, %v265_v28  ;;  %v247_v35 = vmul.f32 %v245_v34, %v626_v3 }
  0xb8   :  { %v286_v31 = vsub.f32 1.0, %v285_v29 }
  0xb9   :  { %299 = vperm.xlu0 %438, %v266_v30  }
  0xbd   :  { %439 = vset.pattern.permute.xlu0 %v555_v16 }
  0xbe   :  { %336 = vperm.xlu0 %439, %v286_v31  }
  0xc2   :  { %369 = vperm.xlu0 %439, %v266_v30  }
 0x111   :  { %v143_v32 = vpop.f32.mrb[0].mxu0 }
 0x112   :  { %v145_v33 = vpop.f32.mrb[1].mxu0  ;;  %v214_v44 = vpop.f32.mrb[0].mxu1  ;;  %v234_v63 = vadd.f32 %v222_v61, %v143_v32 }
 0x113   :  { %v406_v45 = vpop.f32.mrb[1].mxu1  ;;  %v235_v2 = vadd.f32 %v226_v0, %v145_v33 }
 0x11f   :  { %v269_v37 = vpop.permute.xlu1 %268 }
 0x120   :  { %v275_v38 = vpop.permute.xlu0 %274  ;;  %v271_v39 = vsub.f32 %v243_v36, %v269_v37  ;;  %v279_v42 = vadd.f32 %v269_v37, %v243_v36 }
 0x121   :  { %v293_v40 = vsub.f32 %v247_v35, %v275_v38  ;;  %v277_v47 = vadd.f32 %v275_v38, %v247_v35 }
 0x122   :  { %v272_v41 = vmul.f32 2.0, %v271_v39  ;;  %v280_v46 = vmul.f32 2.0, %v279_v42 }
 0x123   :  { %v294_v43 = vmul.f32 2.0, %v293_v40  ;;  %v289_v48 = vpop.permute.xlu1 %288  ;;  %v278_v50 = vmul.f32 2.0, %v277_v47 }
 0x124   :  { %305 = vperm.xlu1 %440, %v272_v41   ;;  %v291_v51 = vsub.f32 %v243_v36, %v289_v48  ;;  %v295_v53 = vadd.f32 %v289_v48, %v243_v36 }
 0x125   :  { %357 = vperm.xlu0 %439, %v294_v43  }
 0x126   :  { %v292_v52 = vmul.f32 2.0, %v291_v51  ;;  %v296_v54 = vmul.f32 2.0, %v295_v53 }
 0x128   :  { %330 = vperm.xlu1 %440, %v280_v46  }
 0x129   :  { %443 = vset.pattern.permute.xlu0 %v557_v49 }
 0x12a   :  { %323 = vperm.xlu0 %443, %v626_v3  }
 0x12c   :  { %312 = vperm.xlu1 %440, %v278_v50  }
 0x12e   :  { %445 = vset.pattern.permute.xlu0 %v555_v16 }
 0x130   :  { %441 = vset.pattern.permute.xlu1 %v551_v12 }
 0x131   :  { %343 = vperm.xlu1 %441, %v292_v52  }
 0x135   :  { %363 = vperm.xlu1 %441, %v296_v54  }
 0x138   :  { %v300_v1 = vpop.permute.xlu0 %299 }
 0x139   :  { %442 = vset.pattern.permute.xlu1 %v558_v55  ;;  %v302_v4 = vmul.f32 %v300_v1, %v234_v63 }
 0x13a   :  { %318 = vperm.xlu1 %442, %v626_v3  }
 0x13d   :  { %v337_v8 = vpop.permute.xlu0 %336 }
 0x13e   :  { %444 = vset.pattern.permute.xlu1 %v559_v56  ;;  %v339_v11 = vmul.f32 %v337_v8, %v235_v2 }
 0x13f   :  { %350 = vperm.xlu1 %444, %v626_v3   ;;  %v230_v3 = vrot.slane %v55_v60, %v229_v5 }
 0x141   :  { %v236_v13 = vadd.f32 %v230_v3, %v214_v44  ;;  %v370_v16 = vpop.permute.xlu0 %369 }
 0x143   :  { %v372_v26 = vmul.f32 %v370_v16, %v236_v13 }
 0x1a3   :  { %v306_v6 = vpop.permute.xlu1 %305 }
 0x1a4   :  { %v308_v7 = vmul.f32 %v306_v6, %v235_v2  ;;  %v358_v21 = vpop.permute.xlu0 %357 }
 0x1a5   :  { %v360_v24 = vmul.f32 %v358_v21, %v234_v63 }
 0x1a6   :  { %v309_v9 = vadd.f32 %v308_v7, %v302_v4 }
 0x1a7   :  { %v331_v10 = vpop.permute.xlu1 %330 }
 0x1a8   :  { %v333_v12 = vmul.f32 %v331_v10, %v234_v63 }
 0x1a9   :  { %v324_v30 = vpop.permute.xlu0 %323 }
 0x1aa   :  { %v340_v14 = vadd.f32 %v339_v11, %v333_v12 }
 0x1ab   :  { %v313_v15 = vpop.permute.xlu1 %312 }
 0x1ac   :  { %v315_v17 = vmul.f32 %v313_v15, %v236_v13 }
 0x1ae   :  { %v316_v18 = vadd.f32 %v315_v17, %v309_v9 }
 0x1b0   :  { %v344_v19 = vpop.permute.xlu1 %343 }
 0x1b1   :  { %v346_v20 = vmul.f32 %v344_v19, %v236_v13 }
 0x1b3   :  { %v347_v22 = vadd.f32 %v346_v20, %v340_v14 }
 0x1b4   :  { %v364_v23 = vpop.permute.xlu1 %363 }
 0x1b5   :  { %v366_v25 = vmul.f32 %v364_v23, %v235_v2 }
 0x1b7   :  { %v367_v27 = vadd.f32 %v366_v25, %v360_v24 }
 0x1b9   :  { %v373_v28 = vadd.f32 %v372_v26, %v367_v27  ;;  %v319_v29 = vpop.permute.xlu1 %318 }
 0x1ba   :  { %v321_v31 = vmul.f32 %v319_v29, %v316_v18  ;;  %v348_v34 = vmul.f32 %v347_v22, %v319_v29 }
 0x1bb   :  { %v374_v32 = vmul.f32 %v373_v28, %v319_v29 }
 0x1bc   :  { %v326_v33 = vadd.f32 %v324_v30, %v321_v31 }
 0x1bd   :  { %375 = vst [vmem:[#allocation8 + $0x10] sm:$0xff] %v374_v32 }
 0x1be   :  { %327 = vst [vmem:[#allocation8] sm:$0xff] %v326_v33  ;;  %v351_v35 = vpop.permute.xlu1 %350 }
 0x1bf   :  { %v353_v36 = vadd.f32 %v351_v35, %v348_v34 }
 0x1c1   :  { %354 = vst [vmem:[#allocation8 + $0x8] sm:$0xff] %v353_v36 }
 0x1c2   :  { %523 = shalt.err (!%p520_p0)
}
 0x1c3   :  { %s524_s10 = scalar_lea.hbm %s670_s4, 384 }
 0x1c4   :  { %p525_p1 = scmp.ne.s32.totalorder %s670_s4, %s524_s10  ;;  %p528_p2 = scmp.lt.u32.totalorder %s524_s10, %s670_s4 }
 0x1c6   :  { %p530_p3 = pnand %p528_p2, %p525_p1 }
 0x1c8   :  { %533 = shalt.err (!%p530_p3)
}
 0x1c9   :  { %385 = dma.vmem_to_hbm [thread:$0]  %s383_s6, 384, %s670_s4, [#allocation4]  }
 0x1ca   :  { %538 = dma.done.wait [#allocation4], 384  }
 0x1cb   :  { %539 = vsyncadd [#allocation4], 4294966912 }
 0x1cc   :  { %389 = vsyncpa [#allocation3], 1 }
 0x1cd   :  { %390 = vsyncpa [#allocation6], 1 }
 0x1ce   :  { %391 = vsyncpa [#allocation4], 1 }

</bundles_post_ra>
